<compile_context>
chip_gen: v6e
topology: v6e:2x2x1
jax: 0.10.0
libtpu: 0.0.40
codegen_flags: <defaults>
</compile_context>

<pallas_src>
import jax
import jax.numpy as jnp
from jax import lax
from jax.experimental import pallas as pl
from jax.experimental.pallas import tpu as pltpu

_INV_SQRT2 = 0.7071067811865476


def _glu_kernel(x_ref, gate_ref, out_ref):
    """GELU(gate) * x on one (tm, h_blk) tile. erf in f32, multiply/store in I/O dtype."""
    g = gate_ref[...].astype(jnp.float32)
    gelu = 0.5 * g * (1.0 + lax.erf(g * _INV_SQRT2))
    out_ref[...] = (gelu.astype(x_ref.dtype) * x_ref[...]).astype(out_ref.dtype)


def _round_up(x, mult):
    return (x + mult - 1) // mult * mult


def _sublane(dtype):
    # sublane packing: 8 rows for 4-byte, 16 for 2-byte, 32 for 1-byte dtypes
    return {4: 8, 2: 16, 1: 32}.get(jnp.dtype(dtype).itemsize, 8)


def glu_pallas(inputs, *, tile_bytes=2 * 1024 * 1024):
    """inputs: (..., 2*H) -> (..., H), computed as GELU(gate) * x."""
    *lead, two_h = inputs.shape
    assert two_h % 2 == 0, "last dim must be even for GLU chunk"
    h = two_h // 2
    m = 1
    for d in lead:
        m *= d
    flat = inputs.reshape(m, two_h)

    dtype = inputs.dtype
    itemsize = jnp.dtype(dtype).itemsize
    sub = _sublane(dtype)

    lane_aligned = (h % 128 == 0)

    if lane_aligned:
        # Read both halves straight out of `flat` with two BlockSpecs (zero extra
        # HBM traffic, no wrapper-side split/copy).
        h_blk = h
        if h > 2048:
            h_blk = 128
            for cand in range(2048, 127, -128):
                if h % cand == 0:
                    h_blk = cand
                    break
        n_hb = h // h_blk
        x_in, gate_in = flat, flat
        x_map = lambda i, j: (i, j)
        gate_map = lambda i, j, _n=n_hb: (i, j + _n)   # gate half starts at col H
        out_cols = h
    else:
        # Unaligned hidden dim (small/demo shapes): split + zero-pad each half to a
        # 128-lane-dense slab so the output stores are full-width.
        h_pad = _round_up(h, 128)
        pad = [(0, 0), (0, h_pad - h)]
        x_in = jnp.pad(flat[:, :h], pad)
        gate_in = jnp.pad(flat[:, h:], pad)
        h_blk = h_pad
        n_hb = 1
        x_map = lambda i, j: (i, j)
        gate_map = lambda i, j: (i, j)
        out_cols = h_pad

    # Row tile: largest multiple of the sublane packing keeping each (tm, h_blk)
    # buffer near `tile_bytes`.  3 buffers (x, gate, out) x double-buffering at
    # ~2 MiB each ~= 12 MiB, inside the scoped VMEM limit on all generations.
    tm = max(sub, (tile_bytes // (h_blk * itemsize)) // sub * sub)
    tm = min(tm, _round_up(m, sub))

    grid = (pl.cdiv(m, tm), n_hb)

    out_flat = pl.pallas_call(
        _glu_kernel,
        out_shape=jax.ShapeDtypeStruct((m, out_cols), dtype),
        grid_spec=pltpu.PrefetchScalarGridSpec(
            num_scalar_prefetch=0,
            grid=grid,
            in_specs=[
                pl.BlockSpec((tm, h_blk), x_map),
                pl.BlockSpec((tm, h_blk), gate_map),
            ],
            out_specs=pl.BlockSpec((tm, h_blk), lambda i, j: (i, j)),
        ),
        compiler_params=pltpu.CompilerParams(
            dimension_semantics=("parallel", "parallel"),
            vmem_limit_bytes=32 * 1024 * 1024,
        ),
    )(x_in, gate_in)

    if not lane_aligned:
        out_flat = out_flat[:, :h]
    return out_flat.reshape(*lead, h)


def _ref_glu(x_in):
    x_part, gate_part = jnp.split(x_in, 2, axis=-1)
    return jax.nn.gelu(gate_part, approximate=False) * x_part


if __name__ == "__main__":
    key = jax.random.PRNGKey(0)

    # Small demo shape consistent with the module: (batch, seq, 2*hidden).
    batch, seq, hidden = 2, 8, 32
    x_small = jax.random.normal(key, (batch, seq, 2 * hidden), dtype=jnp.float32)
    out_small = jax.block_until_ready(glu_pallas(x_small))
    assert out_small.shape == (batch, seq, hidden)
    assert jnp.allclose(out_small, _ref_glu(x_small), atol=1e-5, rtol=1e-5)

    # Also exercise the lane-aligned fast path (H multiple of 128, no padding).
    hidden2 = 128
    x_big = jax.random.normal(jax.random.PRNGKey(1),
                              (batch, seq, 2 * hidden2), dtype=jnp.float32)
    out_big = jax.block_until_ready(glu_pallas(x_big))
    assert out_big.shape == (batch, seq, hidden2)
    assert jnp.allclose(out_big, _ref_glu(x_big), atol=1e-5, rtol=1e-5)

    print("KERNEL_OK")
</pallas_src>

<mosaic_0001>
module attributes {stable_mosaic.version = 11 : i64} {
  func.func @_glu_kernel(%arg0: i32, %arg1: i32, %arg2: memref<16x128xf32, #tpu.memory_space<vmem>>, %arg3: memref<16x128xf32, #tpu.memory_space<vmem>>, %arg4: memref<16x128xf32, #tpu.memory_space<vmem>>) attributes {dimension_semantics = [#tpu.dimension_semantics<parallel>, #tpu.dimension_semantics<parallel>], iteration_bounds = array<i64: 1, 1>, scalar_prefetch = 0 : i64, scratch_operands = 0 : i64, tpu.core_type = #tpu.core_type<tc>, window_params = [{transform_indices = @transform_0, window_bounds = array<i64: 16, 128>}, {transform_indices = @transform_1, window_bounds = array<i64: 16, 128>}, {transform_indices = @transform_2, window_bounds = array<i64: 16, 128>}]} {
    %c0 = arith.constant 0 : index
    %c0_0 = arith.constant 0 : index
    %0 = vector.load %arg3[%c0, %c0_0] : memref<16x128xf32, #tpu.memory_space<vmem>>, vector<16x128xf32>
    %cst = arith.constant 5.000000e-01 : f32
    %1 = vector.broadcast %cst : f32 to vector<16x128xf32>
    %2 = arith.mulf %1, %0 : vector<16x128xf32>
    %cst_1 = arith.constant 0.707106769 : f32
    %3 = vector.broadcast %cst_1 : f32 to vector<16x128xf32>
    %4 = arith.mulf %0, %3 : vector<16x128xf32>
    %5 = math.erf %4 : vector<16x128xf32>
    %cst_2 = arith.constant 1.000000e+00 : f32
    %6 = vector.broadcast %cst_2 : f32 to vector<16x128xf32>
    %7 = arith.addf %6, %5 : vector<16x128xf32>
    %8 = arith.mulf %2, %7 : vector<16x128xf32>
    %c0_3 = arith.constant 0 : index
    %c0_4 = arith.constant 0 : index
    %9 = vector.load %arg2[%c0_3, %c0_4] : memref<16x128xf32, #tpu.memory_space<vmem>>, vector<16x128xf32>
    %10 = arith.mulf %8, %9 : vector<16x128xf32>
    %c0_5 = arith.constant 0 : index
    %c0_6 = arith.constant 0 : index
    %11 = vector.load %arg4[%c0_5, %c0_6] : memref<16x128xf32, #tpu.memory_space<vmem>>, vector<16x128xf32>
    tpu.vector_store %arg4[%c0_5, %c0_6], %10 {strides = array<i32>} : memref<16x128xf32, #tpu.memory_space<vmem>>, vector<16x128xf32>,
    return
  }
  func.func @transform_0(%arg0: i32, %arg1: i32) -> (i32, i32) {
    %c0_i32 = arith.constant 0 : i32
    return %arg0, %arg1 : i32, i32
  }
  func.func @transform_1(%arg0: i32, %arg1: i32) -> (i32, i32) {
    %c0_i32 = arith.constant 0 : i32
    return %arg0, %arg1 : i32, i32
  }
  func.func @transform_2(%arg0: i32, %arg1: i32) -> (i32, i32) {
    %c0_i32 = arith.constant 0 : i32
    return %arg0, %arg1 : i32, i32
  }
}

</mosaic_0001>

<bundles_post_ra>
// kernel: tpu_custom_call.1
= control target key start
LH: loop header
LB: loop body
LE: loop exit
PB: predicated region body
PF: predicated region fallthrough
CT: control target
= control target key end

     0   :  { %7 = vsyncpa [#allocation3], 0  ;;  %s189_s0 = inlined_call_operand.hbm [shape: f32[16,128], index: 0, kind: input, shape index: {}]   ;;  %s190_s1 = inlined_call_operand.hbm [shape: f32[16,128], index: 1, kind: input, shape index: {}]   ;;  %s191_s2 = inlined_call_operand.hbm [shape: f32[16,128], index: 2, kind: output, shape index: {}]  }
   0x1   :  { %8 = vsyncpa [#allocation6], 0 }
   0x2   :  { %9 = vsyncpa [#allocation4], 0  ;;  %s151_s9 = smov [#allocation2]  }
   0x3   :  { %s15_s10 = sshll.u32 %s151_s9, 4  ;;  %s16_s10 = int_to_ptr.vmem [resolvable:$true] %s15_s10 }
   0x4   :  { %s93_s11 = scalar_lea.vmem %s16_s10, 256  ;;  %p98_p1 = scmp.lt.s32.totalorder %s16_s10, %s16_s10 }
   0x5   :  { %p94_p0 = scmp.ne.s32.totalorder %s16_s10, %s93_s11  ;;  %p99_p2 = scmp.lt.s32.totalorder %s93_s11, %s93_s11 }
   0x7   :  { %p100_p3 = por %p99_p2, %p98_p1 }
   0x9   :  { %p101_p4 = pnand %p100_p3, %p94_p0 }
   0xb   :  { %104 = shalt.err (!%p101_p4)
}
   0xc   :  { %s152_s12 = smov 128   ;;  %s153_s13 = smov 8  }
   0xd   :  { %21 = dma.hbm_to_vmem [thread:$0]  %s189_s0, 256, %s16_s10, [#allocation3], %s152_s12, %s152_s12, %s153_s13  }
   0xe   :  { %s154_s16 = smov [#allocation5]  }
   0xf   :  { %s27_s17 = sshll.u32 %s154_s16, 4  ;;  %s28_s17 = int_to_ptr.vmem [resolvable:$true] %s27_s17 }
  0x10   :  { %s113_s18 = scalar_lea.vmem %s28_s17, 256  ;;  %p118_p6 = scmp.lt.s32.totalorder %s28_s17, %s28_s17 }
  0x11   :  { %p114_p5 = scmp.ne.s32.totalorder %s28_s17, %s113_s18  ;;  %p119_p7 = scmp.lt.s32.totalorder %s113_s18, %s113_s18 }
  0x13   :  { %p120_p8 = por %p119_p7, %p118_p6 }
  0x15   :  { %p121_p9 = pnand %p120_p8, %p114_p5 }
  0x17   :  { %124 = shalt.err (!%p121_p9)
}
  0x18   :  { %33 = dma.hbm_to_vmem [thread:$0]  %s190_s1, 256, %s28_s17, [#allocation6], %s152_s12, %s152_s12, %s153_s13  }
  0x19   :  { %145 = dma.done.wait [#allocation3], 256  }
  0x1a   :  { %146 = vsyncadd [#allocation3], 4294967040 }
  0x1b   :  { %147 = dma.done.wait [#allocation6], 256  }
  0x1c   :  { %148 = vsyncadd [#allocation6], 4294967040  ;;  %v40_v0 = vld [vmem:[#allocation5] sm:$0xff]  ;;  %v41_v1 = vld [vmem:[#allocation5 + $0x8] sm:$0xff]  ;;  %s155_s0 = smov [#allocation7]  }
  0x1d   :  { %v44_v2 = vmul.f32 0.70710677, %v40_v0  ;;  %v45_v3 = vmul.f32 0.70710677, %v41_v1  ;;  %v42_v4 = vmul.f32 0.5, %v40_v0  ;;  %v43_v6 = vmul.f32 0.5, %v41_v1 }
  0x1e   :  { %v52_v9 = vld [vmem:[#allocation2] sm:$0xff]  ;;  %v53_v12 = vld [vmem:[#allocation2 + $0x8] sm:$0xff]  ;;  %s63_s1 = sshll.u32 %s155_s0, 4  ;;  %s64_s1 = int_to_ptr.vmem [resolvable:$true] %s63_s1 }
  0x1f   :  { %81 = verf.f32 %v44_v2  ;;  %s125_s21 = scalar_lea.vmem %s64_s1, 256  ;;  %p130_p11 = scmp.lt.s32.totalorder %s64_s1, %s64_s1 }
  0x20   :  { %83 = verf.f32 %v45_v3  ;;  %p126_p10 = scmp.ne.s32.totalorder %s64_s1, %s125_s21  ;;  %p131_p12 = scmp.lt.s32.totalorder %s125_s21, %s125_s21 }
  0x22   :  { %p132_p13 = por %p131_p12, %p130_p11 }
  0x24   :  { %p133_p0 = pnand %p132_p13, %p126_p10 }
  0x2c   :  { %v82_v5 = vpop.eup %81 }
  0x2d   :  { %v84_v7 = vpop.eup %83  ;;  %v48_v8 = vadd.f32 1.0, %v82_v5 }
  0x2e   :  { %v49_v10 = vadd.f32 1.0, %v84_v7 }
  0x2f   :  { %v50_v11 = vmul.f32 %v48_v8, %v42_v4 }
  0x30   :  { %v51_v13 = vmul.f32 %v49_v10, %v43_v6 }
  0x31   :  { %v54_v14 = vmul.f32 %v52_v9, %v50_v11 }
  0x32   :  { %v55_v15 = vmul.f32 %v53_v12, %v51_v13 }
  0x33   :  { %56 = vst [vmem:[#allocation7] sm:$0xff] %v54_v14 }
  0x34   :  { %57 = vst [vmem:[#allocation7 + $0x8] sm:$0xff] %v55_v15 }
  0x35   :  { %136 = shalt.err (!%p133_p0)
}
  0x36   :  { %69 = dma.vmem_to_hbm [thread:$0]  %s64_s1, 256, %s191_s2, [#allocation4], %s152_s12, %s152_s12, %s153_s13  }
  0x37   :  { %149 = dma.done.wait [#allocation4], 256  }
  0x38   :  { %150 = vsyncadd [#allocation4], 4294967040 }
  0x39   :  { %73 = vsyncpa [#allocation3], 1 }
  0x3a   :  { %74 = vsyncpa [#allocation6], 1 }
  0x3b   :  { %75 = vsyncpa [#allocation4], 1 }

</bundles_post_ra>
